<compile_context>
chip_gen: v7x
topology: tpu7x:2x2x1
jax: 0.10.0
libtpu: 0.0.40
codegen_flags: <defaults>
</compile_context>

<pallas_src>
import functools
import math

import jax
import jax.numpy as jnp
from jax.experimental import pallas as pl
from jax.experimental.pallas import tpu as pltpu


_VMEM_BUDGET = 24 * 1024 * 1024          # live-tile budget (headroom everywhere)
_VMEM_LIMIT = 32 * 1024 * 1024           # explicit Mosaic scoped-VMEM limit
_W_RESIDENT_MAX_BYTES = 6 * 1024 * 1024  # resident-W fast path threshold


def _round_up(v, m):
    return ((v + m - 1) // m) * m


def _pow2_floor(v):
    p = 8
    while p * 2 <= v:
        p *= 2
    return p


# ---------------------------------------------------------------------------
# Path A: weight-resident single-pass matmul (no K-reduction grid axis).
# ---------------------------------------------------------------------------
def _resident_w_kernel(x_ref, w_ref, o_ref):
    o_ref[...] = jnp.dot(x_ref[...], w_ref[...],
                         preferred_element_type=jnp.float32).astype(o_ref.dtype)


def _resident_vmem_bytes(tm, K, N, x_bytes, w_bytes):
    # double-buffered x and out blocks + (double-buffered) resident W block
    return 2 * tm * K * x_bytes + 2 * K * N * w_bytes + 2 * tm * N * 4


def _resident_w_matmul(x, w):
    M, K = x.shape
    _, N = w.shape
    x_bytes = jnp.dtype(x.dtype).itemsize
    w_bytes = jnp.dtype(w.dtype).itemsize

    # M-tile: full dim if small, 512 otherwise; for 256 <= M <= 512 split in
    # two so v7x's two TensorCores both get a parallel block.
    if M <= 512:
        tm = M
        if M >= 256:
            tm = _round_up((M + 1) // 2, 8)
    else:
        tm = 512
    if _resident_vmem_bytes(tm, K, N, x_bytes, w_bytes) > _VMEM_BUDGET:
        tm = _pow2_floor(min(M, 512))
        while tm > 8 and _resident_vmem_bytes(tm, K, N, x_bytes, w_bytes) > _VMEM_BUDGET:
            tm //= 2
    if _resident_vmem_bytes(tm, K, N, x_bytes, w_bytes) > _VMEM_BUDGET:
        return None  # caller falls back to the tiled K-reduction path
    assert tm == M or tm % 8 == 0

    grid_m = pl.cdiv(M, tm)
    return pl.pallas_call(
        _resident_w_kernel,
        out_shape=jax.ShapeDtypeStruct((M, N), jnp.float32),
        grid_spec=pltpu.PrefetchScalarGridSpec(
            num_scalar_prefetch=0,
            grid=(grid_m,),
            in_specs=[
                pl.BlockSpec((tm, K), lambda i: (i, 0)),   # x strip
                pl.BlockSpec((K, N), lambda i: (0, 0)),    # resident W (fetched once)
            ],
            out_specs=pl.BlockSpec((tm, N), lambda i: (i, 0)),
        ),
        compiler_params=pltpu.CompilerParams(
            dimension_semantics=("parallel",),
            vmem_limit_bytes=_VMEM_LIMIT),
        cost_estimate=pl.CostEstimate(
            flops=2 * M * K * N,
            transcendentals=0,
            bytes_accessed=M * K * x_bytes + K * N * w_bytes + M * N * 4),
    )(x, w)


# ---------------------------------------------------------------------------
# Path B: tiled K-reduction, output block doubles as the f32 accumulator.
# ---------------------------------------------------------------------------
def _kreduce_kernel(x_ref, w_ref, o_ref):
    @pl.when(pl.program_id(2) == 0)
    def _init():
        o_ref[...] = jnp.zeros_like(o_ref)

    # o_ref's index_map ignores k -> the f32 output block stays resident in
    # VMEM across the reduction; no scratch accumulator needed.
    o_ref[...] += jnp.dot(x_ref[...], w_ref[...],
                          preferred_element_type=jnp.float32)


def _kreduce_matmul(x, w, use_bf16):
    M, K = x.shape
    _, N = w.shape

    in_dtype = jnp.bfloat16 if use_bf16 else jnp.float32
    ib = jnp.dtype(in_dtype).itemsize

    tm = M if M <= 512 else 512                 # full dim or 512 (mult. of 8)
    tn = N if N <= 512 else 512                 # full dim or 512 (mult. of 128)
    tk = 512 if K >= 512 else _round_up(K, 128)
    kp = _round_up(K, tk)
    assert (2 * tm * tk * ib + 2 * tk * tn * ib + 2 * tm * tn * 4) <= _VMEM_BUDGET

    def pad_k(a, axis):
        # Only K needs real zero padding (reduction correctness); the bf16
        # cast is folded into this single copy.  Ragged M/N use cdiv grids.
        a = a.astype(in_dtype)
        if kp != K:
            pad = [(0, 0), (0, 0)]
            pad[axis] = (0, kp - K)
            a = jnp.pad(a, pad)
        return a

    xp = pad_k(x, axis=1)
    wp = pad_k(w, axis=0)

    grid = (pl.cdiv(M, tm), pl.cdiv(N, tn), kp // tk)

    return pl.pallas_call(
        _kreduce_kernel,
        out_shape=jax.ShapeDtypeStruct((M, N), jnp.float32),
        grid_spec=pltpu.PrefetchScalarGridSpec(
            num_scalar_prefetch=0,
            grid=grid,
            in_specs=[
                pl.BlockSpec((tm, tk), lambda i, j, k: (i, k)),
                pl.BlockSpec((tk, tn), lambda i, j, k: (k, j)),
            ],
            out_specs=pl.BlockSpec((tm, tn), lambda i, j, k: (i, j)),
        ),
        compiler_params=pltpu.CompilerParams(
            dimension_semantics=("parallel", "parallel", "arbitrary"),
            vmem_limit_bytes=_VMEM_LIMIT),
        cost_estimate=pl.CostEstimate(
            flops=2 * M * kp * N,
            transcendentals=0,
            bytes_accessed=(grid[1] * M * kp + grid[0] * kp * N) * ib + M * N * 4),
    )(xp, wp)


# ---------------------------------------------------------------------------
# Public forward + param init.
# ---------------------------------------------------------------------------
@functools.partial(jax.jit, static_argnames=("use_bf16",))
def dnn1_forward(x, w, *, use_bf16=True):
    """DNN1 forward: H = x @ W.  x: (M, K), w: (K, N). Returns float32 (M, N).

    use_bf16 only affects the large-W tiled path (inputs cast to bf16 inside
    the single K-pad copy, accumulation always in f32). The weight-resident
    path streams the inputs in their original dtype (no extra HBM pass).
    """
    M, K = x.shape
    K2, N = w.shape
    assert K == K2, f"inner dims mismatch: {K} vs {K2}"

    w_bytes = jnp.dtype(w.dtype).itemsize
    if K * N * w_bytes <= _W_RESIDENT_MAX_BYTES:
        out = _resident_w_matmul(x, w)
        if out is not None:
            return out
    return _kreduce_matmul(x, w, use_bf16)


def init_dnn1_params(key, num_features, hidden_size, gain=1.414):
    """Mirror nn.init.xavier_normal_(W, gain=1.414):
    std = gain * sqrt(2 / (fan_in + fan_out))."""
    std = gain * math.sqrt(2.0 / (num_features + hidden_size))
    return std * jax.random.normal(key, (num_features, hidden_size), jnp.float32)


if __name__ == "__main__":
    key = jax.random.PRNGKey(0)
    kx, kw, kx2, kw2 = jax.random.split(key, 4)

    # DNN1-sized case (weight-resident path): batch=8, num_features=32 -> 32.
    M, NFEAT, NHID = 8, 32, 32
    x = jax.random.normal(kx, (M, NFEAT), jnp.float32)
    w = init_dnn1_params(kw, NFEAT, NHID)
    out = jax.block_until_ready(dnn1_forward(x, w))
    ref = x @ w
    assert out.shape == (M, NHID)
    assert jnp.allclose(out, ref, atol=5e-2, rtol=2e-2), (
        float(jnp.max(jnp.abs(out - ref))))

    # Larger case exercising the tiled K-reduction path (K padded, ragged N).
    M2, K2, N2 = 300, 1100, 2000
    x2 = jax.random.normal(kx2, (M2, K2), jnp.float32)
    w2 = init_dnn1_params(kw2, K2, N2)
    out2 = jax.block_until_ready(dnn1_forward(x2, w2))
    ref2 = x2 @ w2
    assert out2.shape == (M2, N2)
    assert jnp.allclose(out2, ref2, atol=8e-2, rtol=3e-2), (
        float(jnp.max(jnp.abs(out2 - ref2))))

    print("KERNEL_OK")
</pallas_src>

<mosaic_0001>
module attributes {stable_mosaic.version = 11 : i64} {
  func.func @_resident_w_kernel(%arg0: i32, %arg1: memref<8x32xf32, #tpu.memory_space<vmem>>, %arg2: memref<32x32xf32, #tpu.memory_space<vmem>>, %arg3: memref<8x32xf32, #tpu.memory_space<vmem>>) attributes {dimension_semantics = [#tpu.dimension_semantics<parallel>], iteration_bounds = array<i64: 1>, scalar_prefetch = 0 : i64, scratch_operands = 0 : i64, tpu.core_type = #tpu.core_type<tc>, window_params = [{transform_indices = @transform_0, window_bounds = array<i64: 8, 32>}, {pipeline_mode = #tpu.pipeline_mode<synchronous>, transform_indices = @transform_1, window_bounds = array<i64: 32, 32>}, {transform_indices = @transform_2, window_bounds = array<i64: 8, 32>}]} {
    %c0 = arith.constant 0 : index
    %c0_0 = arith.constant 0 : index
    %0 = vector.load %arg1[%c0, %c0_0] : memref<8x32xf32, #tpu.memory_space<vmem>>, vector<8x32xf32>
    %c0_1 = arith.constant 0 : index
    %c0_2 = arith.constant 0 : index
    %1 = vector.load %arg2[%c0_1, %c0_2] : memref<32x32xf32, #tpu.memory_space<vmem>>, vector<32x32xf32>
    %cst = arith.constant dense<0.000000e+00> : vector<8x32xf32>
    %2 = tpu.matmul %0, %1, %cst {dimension_numbers = #tpu.dot_dimension_numbers<[1], [0], [0], [1], [0, 0, 1, 1], [], []>} : vector<8x32xf32>, vector<32x32xf32>, vector<8x32xf32> -> vector<8x32xf32>
    %c0_3 = arith.constant 0 : index
    %c0_4 = arith.constant 0 : index
    %3 = vector.load %arg3[%c0_3, %c0_4] : memref<8x32xf32, #tpu.memory_space<vmem>>, vector<8x32xf32>
    tpu.vector_store %arg3[%c0_3, %c0_4], %2 {strides = array<i32>} : memref<8x32xf32, #tpu.memory_space<vmem>>, vector<8x32xf32>,
    return
  }
  func.func @transform_0(%arg0: i32) -> (i32, i32) {
    %c0_i32 = arith.constant 0 : i32
    %c0_i32_0 = arith.constant 0 : i32
    return %arg0, %c0_i32 : i32, i32
  }
  func.func @transform_1(%arg0: i32) -> (i32, i32) {
    %c0_i32 = arith.constant 0 : i32
    %c0_i32_0 = arith.constant 0 : i32
    %c0_i32_1 = arith.constant 0 : i32
    return %c0_i32, %c0_i32_0 : i32, i32
  }
  func.func @transform_2(%arg0: i32) -> (i32, i32) {
    %c0_i32 = arith.constant 0 : i32
    %c0_i32_0 = arith.constant 0 : i32
    return %arg0, %c0_i32 : i32, i32
  }
}

</mosaic_0001>

<bundles_post_ra>
// kernel: dnn1_forward.1
= control target key start
LH: loop header
LB: loop body
LE: loop exit
PB: predicated region body
PF: predicated region fallthrough
CT: control target
= control target key end

     0   :  { %7 = vsyncpa [#allocation3], 0  ;;  %s303_s0 = inlined_call_operand.hbm [shape: f32[8,32], index: 0, kind: input, shape index: {}]   ;;  %s304_s1 = inlined_call_operand.hbm [shape: f32[32,32], index: 1, kind: input, shape index: {}]   ;;  %s305_s2 = inlined_call_operand.hbm [shape: f32[8,32], index: 2, kind: output, shape index: {}]  }
   0x1   :  { %8 = vsyncpa [#allocation6], 0 }
   0x2   :  { %9 = vsyncpa [#allocation4], 0  ;;  %s237_s9 = smov [#allocation2]   ;;  %s238_s11 = smov [#allocation5]  }
   0x3   :  { %s16_s10 = sshll.u32 %s237_s9, 4  ;;  %s25_s12 = sshll.u32 %s238_s11, 4  ;;  %s17_s10 = int_to_ptr.vmem [resolvable:$true] %s16_s10  ;;  %s260_s12 = int_to_ptr.vmem [resolvable:$true] %s25_s12 }
   0x4   :  { %s165_s15 = scalar_lea.hbm %s303_s0, 128 }
   0x5   :  { %p166_p0 = scmp.ne.s32.totalorder %s303_s0, %s165_s15  ;;  %p169_p1 = scmp.lt.u32.totalorder %s165_s15, %s303_s0 }
   0x7   :  { %p171_p2 = pnand %p169_p1, %p166_p0 }
   0x9   :  { %174 = shalt.err (!%p171_p2)
}
   0xa   :  { %s175_s20 = scalar_lea.vmem %s17_s10, 128  ;;  %p180_p4 = scmp.lt.s32.totalorder %s17_s10, %s17_s10 }
   0xb   :  { %p176_p3 = scmp.ne.s32.totalorder %s17_s10, %s175_s20  ;;  %p181_p5 = scmp.lt.s32.totalorder %s175_s20, %s175_s20 }
   0xd   :  { %p182_p6 = por %p181_p5, %p180_p4 }
   0xf   :  { %p183_p7 = pnand %p182_p6, %p176_p3 }
  0x11   :  { %186 = shalt.err (!%p183_p7)
}
  0x12   :  { %19 = dma.hbm_to_vmem [thread:$0]  %s303_s0, 128, %s17_s10, [#allocation3]  }
  0x13   :  { %s187_s25 = scalar_lea.hbm %s304_s1, 512 }
  0x14   :  { %p188_p8 = scmp.ne.s32.totalorder %s304_s1, %s187_s25  ;;  %p191_p9 = scmp.lt.u32.totalorder %s187_s25, %s304_s1 }
  0x16   :  { %p193_p10 = pnand %p191_p9, %p188_p8 }
  0x18   :  { %196 = shalt.err (!%p193_p10)
}
  0x19   :  { %s197_s30 = scalar_lea.vmem %s260_s12, 512  ;;  %p202_p12 = scmp.lt.s32.totalorder %s260_s12, %s260_s12 }
  0x1a   :  { %p198_p11 = scmp.ne.s32.totalorder %s260_s12, %s197_s30  ;;  %p203_p13 = scmp.lt.s32.totalorder %s197_s30, %s197_s30 }
  0x1c   :  { %p204_p0 = por %p203_p13, %p202_p12 }
  0x1e   :  { %p205_p1 = pnand %p204_p0, %p198_p11 }
  0x20   :  { %208 = shalt.err (!%p205_p1)
}
  0x21   :  { %s239_s0 = smov 128   ;;  %s240_s3 = smov 8  }
  0x22   :  { %31 = dma.hbm_to_vmem [thread:$0]  %s304_s1, 512, %s260_s12, [#allocation6], %s239_s0, %s239_s0, %s240_s3  }
  0x23   :  { %231 = dma.done.wait [#allocation3], 128  }
  0x24   :  { %232 = vsyncadd [#allocation3], 4294967168 }
  0x25   :  { %233 = dma.done.wait [#allocation6], 512  }
  0x26   :  { %234 = vsyncadd [#allocation6], 4294966784  ;;  %v241_v0 = vmov 0.0|0.0   ;;  %vm242_vm0 = vmmov 0   ;;  %v243_v1 = vmov 0.0   ;;  %v39_v2 = vld [vmem:[#allocation5] sm:$0xff] }
  0x27   :  { %151 = vmatprep.subr.bf16.mxu0 %v241_v0  ;;  %148 = vmatprep.mubr.msk.f32.mxu0 %vm242_vm0, %v243_v1  ;;  %v40_v3 = vld [vmem:[#allocation5 + $0x8] sm:$0xff]  ;;  %v41_v4 = vld [vmem:[#allocation5 + $0x10] sm:$0xff]  ;;  %v42_v6 = vld [vmem:[#allocation5 + $0x18] sm:$0xff]  ;;  %vm43_vm1 = vcmask 261120   ;;  %s244_s1 = smov [#allocation7]  }
  0x28   :  { %v152_v5 = vpack.c.bf16 %v40_v3, %v39_v2  ;;  %v155_v7 = vpack.c.bf16 %v42_v6, %v41_v4  ;;  %v38_v8 = vld [vmem:[#allocation2] sm:$0xff]  ;;  %s124_s6 = sshll.u32 %s244_s1, 4  ;;  %s125_s6 = int_to_ptr.vmem [resolvable:$true] %s124_s6 }
  0x29   :  { %s209_s7 = scalar_lea.vmem %s125_s6, 128  ;;  %p214_p3 = scmp.lt.s32.totalorder %s125_s6, %s125_s6 }
  0x2a   :  { %153 = vmatpush3.bf16.msra.mxu0 %v152_v5  ;;  %p210_p2 = scmp.ne.s32.totalorder %s125_s6, %s209_s7  ;;  %p215_p4 = scmp.lt.s32.totalorder %s209_s7, %s209_s7 }
  0x2b   :  { %154 = vmatprep.subr.bf16.mxu0 %v241_v0 }
  0x2c   :  { %p216_p5 = por %p215_p4, %p214_p3 }
  0x2e   :  { %156 = vmatpush3.bf16.msra.mxu0 %v155_v7  ;;  %p217_p6 = pnand %p216_p5, %p210_p2 }
  0x31   :  { %149 = vmatmul.mubr.msk.f32.vlgmr.msra.gmra.mrb[0].mxu0 %vm43_vm1, %v38_v8 }
 0x104   :  { %v113_v9 = vpop.f32.mrb[0].mxu0 }
 0x105   :  { %117 = vst.msk [vmem:[#allocation7] sm:$0xff] %vm43_vm1, %v113_v9  ;;  %v150_v10 = vpop.f32.mrb[1].mxu0 }
 0x106   :  { %220 = shalt.err (!%p217_p6)
}
 0x107   :  { %s221_s10 = scalar_lea.hbm %s305_s2, 128 }
 0x108   :  { %p222_p7 = scmp.ne.s32.totalorder %s305_s2, %s221_s10  ;;  %p225_p8 = scmp.lt.u32.totalorder %s221_s10, %s305_s2 }
 0x10a   :  { %p227_p9 = pnand %p225_p8, %p222_p7 }
 0x10c   :  { %230 = shalt.err (!%p227_p9)
}
 0x10d   :  { %127 = dma.vmem_to_hbm [thread:$0]  %s125_s6, 128, %s305_s2, [#allocation4]  }
 0x10e   :  { %235 = dma.done.wait [#allocation4], 128  }
 0x10f   :  { %236 = vsyncadd [#allocation4], 4294967168 }
 0x110   :  { %131 = vsyncpa [#allocation3], 1 }
 0x111   :  { %132 = vsyncpa [#allocation6], 1 }
 0x112   :  { %133 = vsyncpa [#allocation4], 1 }

</bundles_post_ra>
